<compile_context>
chip_gen: v7x
topology: tpu7x:2x2x1
jax: 0.10.0
libtpu: 0.0.40
codegen_flags: <defaults>
</compile_context>

<pallas_src>
import numpy as np
import jax
import jax.numpy as jnp
from jax.experimental import pallas as pl
from jax.experimental.pallas import tpu as pltpu


_W = 512          # lanes per row (4 full 128-lane vregs)
_TILE_ROWS = 1024  # max rows per grid step -> 512K elems, ~10 MiB double-buffered


def _one_hot_kernel(x_ref, o_ref):
    # x_ref: (tile_rows, W) int32 indices   — fully dense tile.
    # o_ref: (C, tile_rows, W) int8 one-hot — each class slab is a dense 2-D
    #        tile, so every store is an unmasked full-lane vst.
    num_classes = o_ref.shape[0]
    x = x_ref[...]
    for c in range(num_classes):          # static unroll: 6 scalar-compare slabs
        o_ref[c, :, :] = (x == c).astype(o_ref.dtype)


def _one_hot_impl(x, num_classes):
    orig_shape = tuple(x.shape)
    n = int(np.prod(orig_shape)) if len(orig_shape) > 0 else 1

    # Zero-size input (the "zero_size" case): pure shape plumbing, no launch.
    if n == 0:
        return jnp.zeros(orig_shape + (num_classes,), dtype=jnp.int32)

    # Flatten to (n_rows, W); pad only to W-row granularity (skipped if aligned).
    n_rows = -(-n // _W)
    n_pad = n_rows * _W

    x_flat = x.reshape(-1).astype(jnp.int32)
    if n_pad != n:
        # Padded tail is sliced off below, so the pad value is irrelevant.
        x_flat = jnp.pad(x_flat, (0, n_pad - n))
    x2 = x_flat.reshape(n_rows, _W)

    # Row tiling: full-dim block for small inputs; otherwise a multiple of 32
    # (int8 sublane tile), capped at _TILE_ROWS, chosen so grid >= 2 (v7x TCs).
    if n_rows <= 64:
        tile_rows = n_rows
    else:
        tile_rows = min(_TILE_ROWS, -(-((n_rows + 1) // 2) // 32) * 32)
    grid_rows = pl.cdiv(n_rows, tile_rows)  # ragged last block handled by Pallas

    out = pl.pallas_call(
        _one_hot_kernel,
        out_shape=jax.ShapeDtypeStruct((num_classes, n_rows, _W), jnp.int8),
        grid=(grid_rows,),
        in_specs=[pl.BlockSpec((tile_rows, _W), lambda i: (i, 0))],
        out_specs=pl.BlockSpec((num_classes, tile_rows, _W),
                               lambda i: (0, i, 0)),
        compiler_params=pltpu.CompilerParams(
            dimension_semantics=("parallel",)),
    )(x2)

    # Epilogue (inside the same jit -> single fused XLA pass):
    # (C, n_rows, W) int8 -> (C, n_pad) -> [:, :n] -> (n, C) -> int32 -> shape.
    out = out.reshape(num_classes, n_pad)[:, :n].T.astype(jnp.int32)
    return out.reshape(orig_shape + (num_classes,))


_one_hot_jit = jax.jit(_one_hot_impl, static_argnums=1)


def one_hot_pallas(x, num_classes=6):
    return _one_hot_jit(x, num_classes)


if __name__ == "__main__":
    key = jax.random.PRNGKey(0)
    # Small index tensor consistent with the module's forward (class ids in [0, 6)).
    x = jax.random.randint(key, (2, 4, 16), minval=0, maxval=6, dtype=jnp.int32)

    out = jax.block_until_ready(one_hot_pallas(x, num_classes=6))

    # Reference check against jax.nn.one_hot (same semantics as torch one_hot).
    ref = jax.nn.one_hot(x, 6, dtype=jnp.int32)
    assert out.shape == (2, 4, 16, 6), out.shape
    assert out.dtype == jnp.int32, out.dtype
    np.testing.assert_array_equal(np.asarray(out), np.asarray(ref))

    # Non-multiple-of-512 flattened size exercises the row-padding / slice path.
    x_odd = jax.random.randint(jax.random.PRNGKey(1), (3, 5, 7),
                               minval=0, maxval=6, dtype=jnp.int32)
    out_odd = jax.block_until_ready(one_hot_pallas(x_odd, num_classes=6))
    np.testing.assert_array_equal(
        np.asarray(out_odd), np.asarray(jax.nn.one_hot(x_odd, 6, dtype=jnp.int32)))

    # Exactly-aligned flattened size (no pad pass at all).
    x_aligned = jax.random.randint(jax.random.PRNGKey(2), (4, 128),
                                   minval=0, maxval=6, dtype=jnp.int32)
    out_aligned = jax.block_until_ready(one_hot_pallas(x_aligned, num_classes=6))
    np.testing.assert_array_equal(
        np.asarray(out_aligned),
        np.asarray(jax.nn.one_hot(x_aligned, 6, dtype=jnp.int32)))

    # Zero-size path the case name refers to.
    x_zero = jnp.zeros((0, 4), dtype=jnp.int32)
    out_zero = jax.block_until_ready(one_hot_pallas(x_zero, num_classes=6))
    assert out_zero.shape == (0, 4, 6), out_zero.shape
    assert out_zero.dtype == jnp.int32, out_zero.dtype

    print("KERNEL_OK")
</pallas_src>

<mosaic_0001>
module attributes {stable_mosaic.version = 11 : i64} {
  func.func @_one_hot_kernel(%arg0: i32, %arg1: memref<1x512xi32, #tpu.memory_space<vmem>>, %arg2: memref<6x1x512xi8, #tpu.memory_space<vmem>>) attributes {dimension_semantics = [#tpu.dimension_semantics<parallel>], iteration_bounds = array<i64: 1>, scalar_prefetch = 0 : i64, scratch_operands = 0 : i64, tpu.core_type = #tpu.core_type<tc>, window_params = [{transform_indices = @transform_0, window_bounds = array<i64: 1, 512>}, {transform_indices = @transform_1, window_bounds = array<i64: 6, 1, 512>}]} {
    %c0 = arith.constant 0 : index
    %c0_0 = arith.constant 0 : index
    %0 = vector.load %arg1[%c0, %c0_0] : memref<1x512xi32, #tpu.memory_space<vmem>>, vector<1x512xi32>
    %c0_i32 = arith.constant 0 : i32
    %1 = vector.broadcast %c0_i32 : i32 to vector<1x512xi32>
    %2 = arith.cmpi eq, %0, %1 : vector<1x512xi32>
    %3 = arith.extui %2 : vector<1x512xi1> to vector<1x512xi8>
    %c0_1 = arith.constant 0 : index
    %c0_2 = arith.constant 0 : index
    %c0_3 = arith.constant 0 : index
    %4 = vector.load %arg2[%c0_1, %c0_2, %c0_3] : memref<6x1x512xi8, #tpu.memory_space<vmem>>, vector<1x1x512xi8>
    %5 = vector.shape_cast %4 : vector<1x1x512xi8> to vector<1x512xi8>
    %6 = vector.shape_cast %3 : vector<1x512xi8> to vector<1x1x512xi8>
    tpu.vector_store %arg2[%c0_1, %c0_2, %c0_3], %6 {strides = array<i32>} : memref<6x1x512xi8, #tpu.memory_space<vmem>>, vector<1x1x512xi8>,
    %c1_i32 = arith.constant 1 : i32
    %7 = vector.broadcast %c1_i32 : i32 to vector<1x512xi32>
    %8 = arith.cmpi eq, %0, %7 : vector<1x512xi32>
    %9 = arith.extui %8 : vector<1x512xi1> to vector<1x512xi8>
    %c1 = arith.constant 1 : index
    %c0_4 = arith.constant 0 : index
    %c0_5 = arith.constant 0 : index
    %10 = vector.load %arg2[%c1, %c0_4, %c0_5] : memref<6x1x512xi8, #tpu.memory_space<vmem>>, vector<1x1x512xi8>
    %11 = vector.shape_cast %10 : vector<1x1x512xi8> to vector<1x512xi8>
    %12 = vector.shape_cast %9 : vector<1x512xi8> to vector<1x1x512xi8>
    tpu.vector_store %arg2[%c1, %c0_4, %c0_5], %12 {strides = array<i32>} : memref<6x1x512xi8, #tpu.memory_space<vmem>>, vector<1x1x512xi8>,
    %c2_i32 = arith.constant 2 : i32
    %13 = vector.broadcast %c2_i32 : i32 to vector<1x512xi32>
    %14 = arith.cmpi eq, %0, %13 : vector<1x512xi32>
    %15 = arith.extui %14 : vector<1x512xi1> to vector<1x512xi8>
    %c2 = arith.constant 2 : index
    %c0_6 = arith.constant 0 : index
    %c0_7 = arith.constant 0 : index
    %16 = vector.load %arg2[%c2, %c0_6, %c0_7] : memref<6x1x512xi8, #tpu.memory_space<vmem>>, vector<1x1x512xi8>
    %17 = vector.shape_cast %16 : vector<1x1x512xi8> to vector<1x512xi8>
    %18 = vector.shape_cast %15 : vector<1x512xi8> to vector<1x1x512xi8>
    tpu.vector_store %arg2[%c2, %c0_6, %c0_7], %18 {strides = array<i32>} : memref<6x1x512xi8, #tpu.memory_space<vmem>>, vector<1x1x512xi8>,
    %c3_i32 = arith.constant 3 : i32
    %19 = vector.broadcast %c3_i32 : i32 to vector<1x512xi32>
    %20 = arith.cmpi eq, %0, %19 : vector<1x512xi32>
    %21 = arith.extui %20 : vector<1x512xi1> to vector<1x512xi8>
    %c3 = arith.constant 3 : index
    %c0_8 = arith.constant 0 : index
    %c0_9 = arith.constant 0 : index
    %22 = vector.load %arg2[%c3, %c0_8, %c0_9] : memref<6x1x512xi8, #tpu.memory_space<vmem>>, vector<1x1x512xi8>
    %23 = vector.shape_cast %22 : vector<1x1x512xi8> to vector<1x512xi8>
    %24 = vector.shape_cast %21 : vector<1x512xi8> to vector<1x1x512xi8>
    tpu.vector_store %arg2[%c3, %c0_8, %c0_9], %24 {strides = array<i32>} : memref<6x1x512xi8, #tpu.memory_space<vmem>>, vector<1x1x512xi8>,
    %c4_i32 = arith.constant 4 : i32
    %25 = vector.broadcast %c4_i32 : i32 to vector<1x512xi32>
    %26 = arith.cmpi eq, %0, %25 : vector<1x512xi32>
    %27 = arith.extui %26 : vector<1x512xi1> to vector<1x512xi8>
    %c4 = arith.constant 4 : index
    %c0_10 = arith.constant 0 : index
    %c0_11 = arith.constant 0 : index
    %28 = vector.load %arg2[%c4, %c0_10, %c0_11] : memref<6x1x512xi8, #tpu.memory_space<vmem>>, vector<1x1x512xi8>
    %29 = vector.shape_cast %28 : vector<1x1x512xi8> to vector<1x512xi8>
    %30 = vector.shape_cast %27 : vector<1x512xi8> to vector<1x1x512xi8>
    tpu.vector_store %arg2[%c4, %c0_10, %c0_11], %30 {strides = array<i32>} : memref<6x1x512xi8, #tpu.memory_space<vmem>>, vector<1x1x512xi8>,
    %c5_i32 = arith.constant 5 : i32
    %31 = vector.broadcast %c5_i32 : i32 to vector<1x512xi32>
    %32 = arith.cmpi eq, %0, %31 : vector<1x512xi32>
    %33 = arith.extui %32 : vector<1x512xi1> to vector<1x512xi8>
    %c5 = arith.constant 5 : index
    %c0_12 = arith.constant 0 : index
    %c0_13 = arith.constant 0 : index
    %34 = vector.load %arg2[%c5, %c0_12, %c0_13] : memref<6x1x512xi8, #tpu.memory_space<vmem>>, vector<1x1x512xi8>
    %35 = vector.shape_cast %34 : vector<1x1x512xi8> to vector<1x512xi8>
    %36 = vector.shape_cast %33 : vector<1x512xi8> to vector<1x1x512xi8>
    tpu.vector_store %arg2[%c5, %c0_12, %c0_13], %36 {strides = array<i32>} : memref<6x1x512xi8, #tpu.memory_space<vmem>>, vector<1x1x512xi8>,
    return
  }
  func.func @transform_0(%arg0: i32) -> (i32, i32) {
    %c0_i32 = arith.constant 0 : i32
    %c0_i32_0 = arith.constant 0 : i32
    return %arg0, %c0_i32 : i32, i32
  }
  func.func @transform_1(%arg0: i32) -> (i32, i32, i32) {
    %c0_i32 = arith.constant 0 : i32
    %c0_i32_0 = arith.constant 0 : i32
    %c0_i32_1 = arith.constant 0 : i32
    return %c0_i32, %arg0, %c0_i32_0 : i32, i32, i32
  }
}

</mosaic_0001>

<bundles_post_ra>
// kernel: _one_hot_impl.1
= control target key start
LH: loop header
LB: loop body
LE: loop exit
PB: predicated region body
PF: predicated region fallthrough
CT: control target
= control target key end

     0   :  { %v16_v0 = vlaneseq  ;;  %v547_v2 = vmov 286326784   ;;  %v548_v4 = vmov 858989090   ;;  %v549_v7 = vmov 1966171168   ;;  %s767_s0 = inlined_call_operand.vmem [shape: s32[1,512], index: 0, kind: input, shape index: {}]   ;;  %s768_s1 = inlined_call_operand.vmem [shape: s8[6,1,512], index: 1, kind: output, shape index: {}]  }
   0x1   :  { %v564_v1 = vld [vmem:[%s767_s0] sm:$0xf]  ;;  %v14_v3 = vunpack.c.l.s4 %v547_v2  ;;  %v21_v5 = vunpack.c.l.s4 %v548_v4  ;;  %v36_v8 = vunpack.c.l.s4 %v549_v7  ;;  %v550_v11 = vmov 0  }
   0x2   :  { %vm11_vm0 = vcmp.eq.s32.totalorder %v564_v1, 0  ;;  %v17_v6 = vshrl.u32 %v16_v0, 7  ;;  %vm109_vm1 = vcmp.eq.s32.totalorder %v564_v1, 1  ;;  %vm193_vm2 = vcmp.eq.s32.totalorder %v564_v1, 2 }
   0x3   :  { %v15_v9 = vunpack.c.0.s8 %v14_v3  ;;  %v22_v10 = vunpack.c.0.s8 %v21_v5  ;;  %v12_v12 = vsel %vm11_vm0, 1, %v550_v11  ;;  %v37_v13 = vunpack.c.0.s8 %v36_v8 }
   0x4   :  { %vm277_vm3 = vcmp.eq.s32.totalorder %v564_v1, 3  ;;  %v110_v19 = vsel %vm109_vm1, 1, %v550_v11  ;;  %v194_v20 = vsel %vm193_vm2, 1, %v550_v11  ;;  %vm91_vm6 = vcmask 1040384  }
   0x5   :  { %v568_v14 = vsub.s32 %v15_v9, %v17_v6  ;;  %v570_v15 = vsub.s32 %v22_v10, %v17_v6  ;;  %v572_v16 = vsub.s32 %v37_v13, %v17_v6  ;;  %vm92_vm7 = vsmask.f32 0 }
   0x6   :  { %v278_v25 = vsel %vm277_vm3, 1, %v550_v11  ;;  %vm361_vm8 = vcmp.eq.s32.totalorder %v564_v1, 4  ;;  %vm94_vm9 = vcmask 1041409   ;;  %vm95_vm10 = vsmask.f32 1024 }
   0x7   :  { %v19_v17 = vrot.slane %v12_v12, %v568_v14  ;;  %v26_v18 = vrot.slane %v12_v12, %v570_v15  ;;  %v117_v21 = vrot.slane %v110_v19, %v568_v14  ;;  %v124_v22 = vrot.slane %v110_v19, %v570_v15 }
   0x8   :  { %v201_v23 = vrot.slane %v194_v20, %v568_v14  ;;  %v208_v24 = vrot.slane %v194_v20, %v570_v15  ;;  %v285_v33 = vrot.slane %v278_v25, %v568_v14  ;;  %v292_v36 = vrot.slane %v278_v25, %v570_v15 }
   0x9   :  { %vm27_vm4 = vcmp.ne.s32.totalorder %v19_v17, 0  ;;  %vm28_vm5 = vcmp.ne.s32.totalorder %v26_v18, 0  ;;  %vm125_vm11 = vcmp.ne.s32.totalorder %v117_v21, 0  ;;  %vm126_vm12 = vcmp.ne.s32.totalorder %v124_v22, 0 }
   0xa   :  { %v29_v26 = vsel %vm27_vm4, 1, %v550_v11  ;;  %v30_v27 = vsel %vm28_vm5, 1, %v550_v11  ;;  %v127_v29 = vsel %vm125_vm11, 1, %v550_v11  ;;  %v128_v30 = vsel %vm126_vm12, 1, %v550_v11 }
   0xb   :  { %v31_v28 = vpack.c.b16 %v30_v27, %v29_v26  ;;  %vm209_vm13 = vcmp.ne.s32.totalorder %v201_v23, 0  ;;  %v129_v31 = vpack.c.b16 %v128_v30, %v127_v29  ;;  %vm210_vm14 = vcmp.ne.s32.totalorder %v208_v24, 0 }
   0xc   :  { %v211_v32 = vsel %vm209_vm13, 1, %v550_v11  ;;  %v212_v35 = vsel %vm210_vm14, 1, %v550_v11  ;;  %v362_v37 = vsel %vm361_vm8, 1, %v550_v11  ;;  %vm98_vm15 = vcmask 1042434   ;;  %vm611_vm14 = vmand %vm91_vm6, %vm92_vm7 }
   0xd   :  { %v32_v34 = vpack.c.b8 %v31_v28, %v31_v28  ;;  %vm99_vm0 = vsmask.f32 2048  ;;  %v130_v38 = vpack.c.b8 %v129_v31, %v129_v31  ;;  %v213_v39 = vpack.c.b16 %v212_v35, %v211_v32 }
   0xe   :  { %vm293_vm1 = vcmp.ne.s32.totalorder %v285_v33, 0  ;;  %v369_v40 = vrot.slane %v362_v37, %v568_v14  ;;  %vm294_vm3 = vcmp.ne.s32.totalorder %v292_v36, 0  ;;  %v376_v42 = vrot.slane %v362_v37, %v570_v15  ;;  %v106_v37 = vld [vmem:[%s768_s1] sm:$0xf] }
   0xf   :  { %vm33_vm2 = vnez %v32_v34  ;;  %v295_v41 = vsel %vm293_vm1, 1, %v550_v11  ;;  %vm131_vm4 = vnez %v130_v38  ;;  %v214_v44 = vpack.c.b8 %v213_v39, %v213_v39 }
  0x10   :  { %v34_v43 = vsel %vm33_vm2, 16843009, %v550_v11  ;;  %v296_v45 = vsel %vm294_vm3, 1, %v550_v11  ;;  %v132_v47 = vsel %vm131_vm4, 16843009, %v550_v11  ;;  %vm377_vm5 = vcmp.ne.s32.totalorder %v369_v40, 0  ;;  %vm621_vm2 = vmand %vm94_vm9, %vm95_vm10 }
  0x11   :  { %v41_v46 = vrot.slane %v34_v43, %v572_v16  ;;  %v297_v48 = vpack.c.b16 %v296_v45, %v295_v41  ;;  %vm102_vm8 = vcmask 1043459   ;;  %vm103_vm11 = vsmask.f32 3072  ;;  %vm97_vm9 = vmor %vm621_vm2, %vm611_vm14 }
  0x12   :  { %v139_v49 = vrot.slane %v132_v47, %v572_v16  ;;  %vm215_vm12 = vnez %v214_v44  ;;  %vm378_vm13 = vcmp.ne.s32.totalorder %v376_v42, 0  ;;  %v379_v50 = vsel %vm377_vm5, 1, %v550_v11  ;;  %v533_v42 = vld [vmem:[%s768_s1 + $0x4] sm:$0xf] }
  0x13   :  { %v42_v51 = vcombine.high %v41_v46, %v41_v46  ;;  %v49_v52 = vrot.slane %v41_v46, %v572_v16  ;;  %v216_v53 = vsel %vm215_vm12, 16843009, %v550_v11  ;;  %v298_v54 = vpack.c.b8 %v297_v48, %v297_v48  ;;  %vm100_vm12 = vmand %vm98_vm15, %vm99_vm0 }
  0x14   :  { %v140_v56 = vcombine.high %v139_v49, %v139_v49  ;;  %v147_v57 = vrot.slane %v139_v49, %v572_v16  ;;  %v223_v58 = vrot.slane %v216_v53, %v572_v16  ;;  %v380_v59 = vsel %vm378_vm13, 1, %v550_v11  ;;  %vm650_vm15 = vmor %vm100_vm12, %vm97_vm9 }
  0x15   :  { %v56_v60 = vrot.slane %v42_v51, %v572_v16  ;;  %v57_v61 = vcombine.high %v49_v52, %v49_v52  ;;  %vm59_vm1 = vnez %v49_v52  ;;  %vm625_vm6 = vnez %v298_v54  ;;  %vm104_vm0 = vmand %vm102_vm8, %vm103_vm11 }
  0x16   :  { %v63_v0 = vsel %vm59_vm1, 16843009, %v550_v11  ;;  %v154_v2 = vrot.slane %v140_v56, %v572_v16  ;;  %v155_v3 = vcombine.high %v147_v57, %v147_v57  ;;  %vm157_vm7 = vnez %v147_v57 }
  0x17   :  { %v58_v4 = vcombine.high %v56_v60, %v56_v60  ;;  %vm60_vm3 = vnez %v56_v60  ;;  %vm61_vm4 = vnez %v57_v61  ;;  %v161_v5 = vsel %vm157_vm7, 16843009, %v550_v11 }
  0x18   :  { %v64_v6 = vsel %vm60_vm3, 16843009, %v550_v11  ;;  %v65_v7 = vsel %vm61_vm4, 16843009, %v550_v11  ;;  %v156_v8 = vcombine.high %v154_v2, %v154_v2  ;;  %vm158_vm10 = vnez %v154_v2 }
  0x19   :  { %vm62_vm5 = vnez %v58_v4  ;;  %v67_v9 = vcombine.low %v63_v0, %v64_v6  ;;  %vm159_vm13 = vnez %v155_v3  ;;  %v162_v10 = vsel %vm158_vm10, 16843009, %v550_v11  ;;  %v535_v0 = vld [vmem:[%s768_s1 + $0x8] sm:$0xf] }
  0x1a   :  { %v66_v12 = vsel %vm62_vm5, 16843009, %v550_v11  ;;  %vm160_vm1 = vnez %v156_v8  ;;  %v163_v13 = vsel %vm159_vm13, 16843009, %v550_v11  ;;  %v165_v17 = vcombine.low %v161_v5, %v162_v10 }
  0x1b   :  { %v68_v18 = vcombine.low %v65_v7, %v66_v12  ;;  %v75_v19 = vrot.slane %v67_v9, %v572_v16  ;;  %v164_v20 = vsel %vm160_vm1, 16843009, %v550_v11  ;;  %v224_v21 = vcombine.high %v223_v58, %v223_v58 }
  0x1c   :  { %v166_v23 = vcombine.low %v163_v13, %v164_v20  ;;  %v173_v24 = vrot.slane %v165_v17, %v572_v16  ;;  %v231_v25 = vrot.slane %v223_v58, %v572_v16  ;;  %v300_v26 = vsel %vm625_vm6, 16843009, %v550_v11  ;;  %vm669_vm6 = vmor %vm104_vm0, %vm650_vm15 }
  0x1d   :  { %v82_v27 = vrot.slane %v68_v18, %v572_v16  ;;  %v238_v28 = vrot.slane %v224_v21, %v572_v16  ;;  %v307_v29 = vrot.slane %v300_v26, %v572_v16  ;;  %v381_v30 = vpack.c.b16 %v380_v59, %v379_v50 }
  0x1e   :  { %v180_v31 = vrot.slane %v166_v23, %v572_v16  ;;  %v239_v32 = vcombine.high %v231_v25, %v231_v25  ;;  %vm241_vm14 = vnez %v231_v25  ;;  %vm445_vm2 = vcmp.eq.s32.totalorder %v564_v1, 5 }
  0x1f   :  { %v83_v33 = vcombine.low %v75_v19, %v82_v27  ;;  %v240_v34 = vcombine.high %v238_v28, %v238_v28  ;;  %vm242_vm7 = vnez %v238_v28  ;;  %v245_v35 = vsel %vm241_vm14, 16843009, %v550_v11 }
  0x20   :  { %v181_v38 = vcombine.low %v173_v24, %v180_v31  ;;  %vm243_vm8 = vnez %v239_v32  ;;  %v246_v39 = vsel %vm242_vm7, 16843009, %v550_v11  ;;  %v308_v40 = vcombine.high %v307_v29, %v307_v29 }
  0x21   :  { %v90_v41 = vrot.slane %v83_v33, %v572_v16  ;;  %vm244_vm11 = vnez %v240_v34  ;;  %v247_v43 = vsel %vm243_vm8, 16843009, %v550_v11  ;;  %v249_v44 = vcombine.low %v245_v35, %v246_v39 }
  0x22   :  { %v188_v45 = vrot.slane %v181_v38, %v572_v16  ;;  %v248_v46 = vsel %vm244_vm11, 16843009, %v550_v11  ;;  %v315_v47 = vrot.slane %v307_v29, %v572_v16  ;;  %v322_v48 = vrot.slane %v308_v40, %v572_v16 }
  0x23   :  { %v107_v49 = vsel %vm669_vm6, %v90_v41, %v106_v37  ;;  %v250_v50 = vcombine.low %v247_v43, %v248_v46  ;;  %v257_v51 = vrot.slane %v249_v44, %v572_v16  ;;  %v382_v52 = vpack.c.b8 %v381_v30, %v381_v30  ;;  %v539_v37 = vld [vmem:[%s768_s1 + $0x10] sm:$0xf] }
  0x24   :  { %108 = vst [vmem:[%s768_s1] sm:$0xf] %v107_v49  ;;  %v191_v53 = vsel %vm669_vm6, %v188_v45, %v533_v42  ;;  %v323_v54 = vcombine.high %v315_v47, %v315_v47  ;;  %v324_v55 = vcombine.high %v322_v48, %v322_v48  ;;  %vm325_vm3 = vnez %v315_v47 }
  0x25   :  { %534 = vst [vmem:[%s768_s1 + $0x4] sm:$0xf] %v191_v53  ;;  %v264_v56 = vrot.slane %v250_v50, %v572_v16  ;;  %vm326_vm4 = vnez %v322_v48  ;;  %v329_v57 = vsel %vm325_vm3, 16843009, %v550_v11  ;;  %vm383_vm9 = vnez %v382_v52 }
  0x26   :  { %vm327_vm10 = vnez %v323_v54  ;;  %vm328_vm5 = vnez %v324_v55  ;;  %v330_v58 = vsel %vm326_vm4, 16843009, %v550_v11  ;;  %v384_v59 = vsel %vm383_vm9, 16843009, %v550_v11  ;;  %v541_v54 = vld [vmem:[%s768_s1 + $0x14] sm:$0xf] }
  0x27   :  { %v265_v60 = vcombine.low %v257_v51, %v264_v56  ;;  %v331_v61 = vsel %vm327_vm10, 16843009, %v550_v11  ;;  %v332_v62 = vsel %vm328_vm5, 16843009, %v550_v11  ;;  %v333_v63 = vcombine.low %v329_v57, %v330_v58 }
  0x28   :  { %v334_v2 = vcombine.low %v331_v61, %v332_v62  ;;  %v391_v3 = vrot.slane %v384_v59, %v572_v16  ;;  %v446_v4 = vsel %vm445_vm2, 1, %v550_v11 }
  0x29   :  { %v272_v5 = vrot.slane %v265_v60, %v572_v16  ;;  %v341_v6 = vrot.slane %v333_v63, %v572_v16  ;;  %v453_v7 = vrot.slane %v446_v4, %v568_v14  ;;  %v460_v8 = vrot.slane %v446_v4, %v570_v15  ;;  %v537_v15 = vld [vmem:[%s768_s1 + $0xc] sm:$0xf] }
  0x2a   :  { %v348_v9 = vrot.slane %v334_v2, %v572_v16  ;;  %v392_v10 = vcombine.high %v391_v3, %v391_v3  ;;  %v399_v12 = vrot.slane %v391_v3, %v572_v16 }
  0x2b   :  { %v275_v13 = vsel %vm669_vm6, %v272_v5, %v535_v0  ;;  %vm461_vm12 = vcmp.ne.s32.totalorder %v453_v7, 0  ;;  %vm462_vm13 = vcmp.ne.s32.totalorder %v460_v8, 0 }
  0x2c   :  { %536 = vst [vmem:[%s768_s1 + $0x8] sm:$0xf] %v275_v13  ;;  %v349_v1 = vcombine.low %v341_v6, %v348_v9  ;;  %v406_v17 = vrot.slane %v392_v10, %v572_v16  ;;  %v407_v14 = vcombine.high %v399_v12, %v399_v12  ;;  %vm409_vm1 = vnez %v399_v12 }
  0x2d   :  { %v413_v18 = vsel %vm409_vm1, 16843009, %v550_v11  ;;  %v463_v19 = vsel %vm461_vm12, 1, %v550_v11  ;;  %v464_v20 = vsel %vm462_vm13, 1, %v550_v11 }
  0x2e   :  { %v356_v21 = vrot.slane %v349_v1, %v572_v16  ;;  %v408_v22 = vcombine.high %v406_v17, %v406_v17  ;;  %vm410_vm15 = vnez %v406_v17  ;;  %vm411_vm0 = vnez %v407_v14 }
  0x2f   :  { %v414_v23 = vsel %vm410_vm15, 16843009, %v550_v11  ;;  %v415_v24 = vsel %vm411_vm0, 16843009, %v550_v11  ;;  %v465_v25 = vpack.c.b16 %v464_v20, %v463_v19 }
  0x30   :  { %v359_v26 = vsel %vm669_vm6, %v356_v21, %v537_v15  ;;  %vm412_vm14 = vnez %v408_v22  ;;  %v417_v27 = vcombine.low %v413_v18, %v414_v23 }
  0x31   :  { %538 = vst [vmem:[%s768_s1 + $0xc] sm:$0xf] %v359_v26  ;;  %v416_v28 = vsel %vm412_vm14, 16843009, %v550_v11  ;;  %v466_v29 = vpack.c.b8 %v465_v25, %v465_v25 }
  0x32   :  { %v418_v30 = vcombine.low %v415_v24, %v416_v28  ;;  %v425_v31 = vrot.slane %v417_v27, %v572_v16 }
  0x33   :  { %vm467_vm2 = vnez %v466_v29 }
  0x34   :  { %v432_v32 = vrot.slane %v418_v30, %v572_v16  ;;  %v468_v33 = vsel %vm467_vm2, 16843009, %v550_v11 }
  0x35   :  { %v475_v34 = vrot.slane %v468_v33, %v572_v16 }
  0x36   :  { %v433_v35 = vcombine.low %v425_v31, %v432_v32 }
  0x37   :  { %v476_v38 = vcombine.high %v475_v34, %v475_v34  ;;  %v483_v39 = vrot.slane %v475_v34, %v572_v16 }
  0x38   :  { %v440_v40 = vrot.slane %v433_v35, %v572_v16 }
  0x39   :  { %v490_v41 = vrot.slane %v476_v38, %v572_v16  ;;  %v491_v42 = vcombine.high %v483_v39, %v483_v39  ;;  %vm493_vm7 = vnez %v483_v39 }
  0x3a   :  { %v443_v43 = vsel %vm669_vm6, %v440_v40, %v539_v37  ;;  %v497_v44 = vsel %vm493_vm7, 16843009, %v550_v11 }
  0x3b   :  { %540 = vst [vmem:[%s768_s1 + $0x10] sm:$0xf] %v443_v43  ;;  %v492_v45 = vcombine.high %v490_v41, %v490_v41  ;;  %vm494_vm8 = vnez %v490_v41  ;;  %vm495_vm11 = vnez %v491_v42 }
  0x3c   :  { %v498_v46 = vsel %vm494_vm8, 16843009, %v550_v11  ;;  %v499_v47 = vsel %vm495_vm11, 16843009, %v550_v11 }
  0x3d   :  { %vm496_vm3 = vnez %v492_v45  ;;  %v501_v48 = vcombine.low %v497_v44, %v498_v46 }
  0x3e   :  { %v500_v49 = vsel %vm496_vm3, 16843009, %v550_v11 }
  0x3f   :  { %v502_v50 = vcombine.low %v499_v47, %v500_v49  ;;  %v509_v51 = vrot.slane %v501_v48, %v572_v16 }
  0x41   :  { %v516_v52 = vrot.slane %v502_v50, %v572_v16 }
  0x43   :  { %v517_v53 = vcombine.low %v509_v51, %v516_v52 }
  0x45   :  { %v524_v55 = vrot.slane %v517_v53, %v572_v16 }
  0x47   :  { %v527_v56 = vsel %vm669_vm6, %v524_v55, %v541_v54 }
  0x48   :  { %542 = vst [vmem:[%s768_s1 + $0x14] sm:$0xf] %v527_v56 }

</bundles_post_ra>
